<compile_context>
chip_gen: v5e
topology: v5e:2x2
jax: 0.10.0
libtpu: 0.0.40
codegen_flags: <defaults>
</compile_context>

<pallas_src>
import functools

import jax
import jax.numpy as jnp
from jax import lax
from jax.experimental import pallas as pl
from jax.experimental.pallas import tpu as pltpu


def _round_up(x, m):
    return ((x + m - 1) // m) * m


def _adain_kernel(x_ref, gamma_ref, beta_ref, o_ref, *, hw):
    # x_ref / o_ref: (tile_rows, HW)   gamma_ref / beta_ref: (tile_rows, 1)
    x = x_ref[...].astype(jnp.float32)

    inv_hw = jnp.float32(1.0 / hw)
    # torch.Tensor.var default is unbiased (divide by HW - 1).
    # Guarded against HW == 1 (PyTorch would produce inf/NaN there).
    inv_hwm1 = jnp.float32(1.0 / max(hw - 1, 1))

    # Single fused sweep: sum and sum-of-squares in one pass.
    s = jnp.sum(x, axis=-1, keepdims=True)
    sq = jnp.sum(x * x, axis=-1, keepdims=True)
    mu = s * inv_hw
    # (sumsq - HW * mu^2) / (HW - 1);  mu * s == HW * mu^2.
    var = jnp.maximum((sq - mu * s) * inv_hwm1, jnp.float32(0.0))

    gamma = gamma_ref[...]
    beta = beta_ref[...]

    # Fused affine: one full-width mul + add; rsqrt runs on the EUP slot.
    scale = gamma * lax.rsqrt(var + jnp.float32(1e-5))
    o_ref[...] = ((x - mu) * scale + beta).astype(o_ref.dtype)


def adain_norm(content, beta, gamma, *, target_block_bytes=None):
    """AdaIN: content (N, C, H, W); beta/gamma broadcastable to (N, C, 1, 1)."""
    N, C, H, W = content.shape
    NC, HW = N * C, H * W
    dtype = content.dtype
    itemsize = jnp.dtype(dtype).itemsize

    # ---- generation-aware budgets (v7x: 64 MiB VMEM/TC; v5e/v6e: 128 MiB) ----
    try:
        vmem_cap = int(pltpu.get_tpu_info().vmem_capacity_bytes)
    except Exception:
        vmem_cap = 64 * 2**20  # conservative: assume the smallest (v7x)
    if target_block_bytes is None:
        target_block_bytes = (4 << 20) if vmem_cap >= (100 << 20) else (1 << 20)

    # Sublane packing: 8 rows for f32, 16 for bf16, 32 for int8.
    pack = max(8, 32 // itemsize)
    bytes_per_row = max(HW * itemsize, 1)

    # TODO(synk): for very large spatial sizes (per-row block of hundreds of
    # KiB+, esp. on v7x's 64 MiB VMEM), add an HW-tiled two-pass variant:
    # accumulate sum/sumsq over an 'arbitrary' HW grid axis into a
    # (tile_rows, 1) VMEM scratch, then normalize in a second sweep.

    # ---- tile selection: block budget + keep enough grid steps ----
    rows_budget = max(pack, (target_block_bytes // bytes_per_row) // pack * pack)
    # Aim for >= ~8 grid steps when NC allows (pipelining + megacore sharding).
    min_tiles = max(1, min(8, pl.cdiv(NC, pack)))
    rows_for_tiles = max(pack, (NC // min_tiles) // pack * pack)
    tile_rows = min(rows_budget, rows_for_tiles)
    num_tiles = pl.cdiv(NC, tile_rows)
    # Balance tiles so the trailing partial block is not tiny.
    tile_rows = _round_up(pl.cdiv(NC, num_tiles), pack)
    num_tiles = pl.cdiv(NC, tile_rows)

    # ---- layout: one (n, c) pair per row, flattened spatial on lanes ----
    # No padding, no post-slice: block last dim == full HW, and the row
    # remainder of the last block is masked by Pallas on write.
    x2d = content.reshape(NC, HW)
    g2d = jnp.broadcast_to(gamma, (N, C, 1, 1)).reshape(NC, 1).astype(jnp.float32)
    b2d = jnp.broadcast_to(beta, (N, C, 1, 1)).reshape(NC, 1).astype(jnp.float32)

    # ---- VMEM accounting (physical block is lane-padded to 128) ----
    hw_lanes = _round_up(HW, 128)
    block_bytes = tile_rows * hw_lanes * itemsize
    f32_block = tile_rows * hw_lanes * 4
    # Double-buffered in/out blocks + in-kernel f32 temporaries + headroom,
    # clamped to ~75% of this generation's physical VMEM.
    need = 4 * block_bytes + 3 * f32_block + (2 << 20)
    vmem_limit = int(min(int(vmem_cap * 0.75), max(32 * 2**20, need)))

    kernel = functools.partial(_adain_kernel, hw=HW)

    cost = pl.CostEstimate(
        flops=7 * NC * HW,
        transcendentals=NC,
        bytes_accessed=2 * NC * HW * itemsize + 2 * NC * 4,
    )

    out2d = pl.pallas_call(
        kernel,
        out_shape=jax.ShapeDtypeStruct((NC, HW), dtype),
        grid_spec=pltpu.PrefetchScalarGridSpec(
            num_scalar_prefetch=0,
            grid=(num_tiles,),
            in_specs=[
                pl.BlockSpec((tile_rows, HW), lambda i: (i, 0)),
                pl.BlockSpec((tile_rows, 1), lambda i: (i, 0)),
                pl.BlockSpec((tile_rows, 1), lambda i: (i, 0)),
            ],
            out_specs=pl.BlockSpec((tile_rows, HW), lambda i: (i, 0)),
        ),
        compiler_params=pltpu.CompilerParams(
            dimension_semantics=("parallel",),
            vmem_limit_bytes=vmem_limit,
        ),
        cost_estimate=cost,
    )(x2d, g2d, b2d)

    return out2d.reshape(N, C, H, W)


def _reference(content, beta, gamma):
    N, C, H, W = content.shape
    xr = content.reshape(N, C, -1).astype(jnp.float32)
    mu = xr.mean(axis=2).reshape(N, C, 1, 1)
    var = xr.var(axis=2, ddof=1).reshape(N, C, 1, 1) + 1e-5
    sigma = jnp.sqrt(var)
    y = (content.astype(jnp.float32) - mu) / sigma
    return (y * gamma + beta).astype(content.dtype)


if __name__ == "__main__":
    key = jax.random.PRNGKey(0)
    kx, kb, kg = jax.random.split(key, 3)

    N, C, H, W = 2, 4, 16, 16
    content = jax.random.normal(kx, (N, C, H, W), dtype=jnp.float32)
    # AdaIN affine params (as produced per-sample by a style MLP): (N, C, 1, 1)
    beta = jax.random.normal(kb, (N, C, 1, 1), dtype=jnp.float32)
    gamma = jax.random.normal(kg, (N, C, 1, 1), dtype=jnp.float32) + 1.0

    out = adain_norm(content, beta, gamma)
    out = jax.block_until_ready(out)

    ref = _reference(content, beta, gamma)
    assert out.shape == (N, C, H, W)
    assert jnp.allclose(out, ref, atol=2e-5, rtol=2e-5), "mismatch vs reference"

    print("KERNEL_OK")
</pallas_src>

<mosaic_0001>
module attributes {stable_mosaic.version = 11 : i64} {
  func.func @_adain_kernel(%arg0: i32, %arg1: memref<8x256xf32, #tpu.memory_space<vmem>>, %arg2: memref<8x1xf32, #tpu.memory_space<vmem>>, %arg3: memref<8x1xf32, #tpu.memory_space<vmem>>, %arg4: memref<8x256xf32, #tpu.memory_space<vmem>>) attributes {dimension_semantics = [#tpu.dimension_semantics<parallel>], iteration_bounds = array<i64: 1>, scalar_prefetch = 0 : i64, scratch_operands = 0 : i64, tpu.core_type = #tpu.core_type<tc>, window_params = [{transform_indices = @transform_0, window_bounds = array<i64: 8, 256>}, {transform_indices = @transform_1, window_bounds = array<i64: 8, 1>}, {transform_indices = @transform_2, window_bounds = array<i64: 8, 1>}, {transform_indices = @transform_3, window_bounds = array<i64: 8, 256>}]} {
    %c0 = arith.constant 0 : index
    %c0_0 = arith.constant 0 : index
    %0 = vector.load %arg1[%c0, %c0_0] : memref<8x256xf32, #tpu.memory_space<vmem>>, vector<8x256xf32>
    %cst = arith.constant dense<0.000000e+00> : vector<8xf32>
    %1 = vector.multi_reduction <add>, %0, %cst [1] : vector<8x256xf32> to vector<8xf32>
    %2 = vector.shape_cast %1 : vector<8xf32> to vector<8x1xf32>
    %3 = arith.mulf %0, %0 : vector<8x256xf32>
    %cst_1 = arith.constant dense<0.000000e+00> : vector<8xf32>
    %4 = vector.multi_reduction <add>, %3, %cst_1 [1] : vector<8x256xf32> to vector<8xf32>
    %5 = vector.shape_cast %4 : vector<8xf32> to vector<8x1xf32>
    %cst_2 = arith.constant 3.906250e-03 : f32
    %6 = vector.broadcast %cst_2 : f32 to vector<8x1xf32>
    %7 = arith.mulf %2, %6 : vector<8x1xf32>
    %8 = arith.mulf %7, %2 : vector<8x1xf32>
    %9 = arith.subf %5, %8 : vector<8x1xf32>
    %cst_3 = arith.constant 0.00392156886 : f32
    %10 = vector.broadcast %cst_3 : f32 to vector<8x1xf32>
    %11 = arith.mulf %9, %10 : vector<8x1xf32>
    %cst_4 = arith.constant 0.000000e+00 : f32
    %12 = vector.broadcast %cst_4 : f32 to vector<8x1xf32>
    %13 = arith.maximumf %11, %12 : vector<8x1xf32>
    %c0_5 = arith.constant 0 : index
    %c0_6 = arith.constant 0 : index
    %14 = vector.load %arg2[%c0_5, %c0_6] : memref<8x1xf32, #tpu.memory_space<vmem>>, vector<8x1xf32>
    %c0_7 = arith.constant 0 : index
    %c0_8 = arith.constant 0 : index
    %15 = vector.load %arg3[%c0_7, %c0_8] : memref<8x1xf32, #tpu.memory_space<vmem>>, vector<8x1xf32>
    %cst_9 = arith.constant 9.99999974E-6 : f32
    %16 = vector.broadcast %cst_9 : f32 to vector<8x1xf32>
    %17 = arith.addf %13, %16 : vector<8x1xf32>
    %18 = math.rsqrt %17 : vector<8x1xf32>
    %19 = arith.mulf %14, %18 : vector<8x1xf32>
    %20 = vector.broadcast %7 : vector<8x1xf32> to vector<8x256xf32>
    %21 = arith.subf %0, %20 : vector<8x256xf32>
    %22 = vector.broadcast %19 : vector<8x1xf32> to vector<8x256xf32>
    %23 = arith.mulf %21, %22 : vector<8x256xf32>
    %24 = vector.broadcast %15 : vector<8x1xf32> to vector<8x256xf32>
    %25 = arith.addf %23, %24 : vector<8x256xf32>
    %c0_10 = arith.constant 0 : index
    %c0_11 = arith.constant 0 : index
    %26 = vector.load %arg4[%c0_10, %c0_11] : memref<8x256xf32, #tpu.memory_space<vmem>>, vector<8x256xf32>
    tpu.vector_store %arg4[%c0_10, %c0_11], %25 {strides = array<i32>} : memref<8x256xf32, #tpu.memory_space<vmem>>, vector<8x256xf32>,
    return
  }
  func.func @transform_0(%arg0: i32) -> (i32, i32) {
    %c0_i32 = arith.constant 0 : i32
    %c0_i32_0 = arith.constant 0 : i32
    return %arg0, %c0_i32 : i32, i32
  }
  func.func @transform_1(%arg0: i32) -> (i32, i32) {
    %c0_i32 = arith.constant 0 : i32
    %c0_i32_0 = arith.constant 0 : i32
    return %arg0, %c0_i32 : i32, i32
  }
  func.func @transform_2(%arg0: i32) -> (i32, i32) {
    %c0_i32 = arith.constant 0 : i32
    %c0_i32_0 = arith.constant 0 : i32
    return %arg0, %c0_i32 : i32, i32
  }
  func.func @transform_3(%arg0: i32) -> (i32, i32) {
    %c0_i32 = arith.constant 0 : i32
    %c0_i32_0 = arith.constant 0 : i32
    return %arg0, %c0_i32 : i32, i32
  }
}

</mosaic_0001>

<bundles_post_ra>
// kernel: tpu_custom_call.1
= control target key start
LH: loop header
LB: loop body
LE: loop exit
PB: predicated region body
PF: predicated region fallthrough
CT: control target
= control target key end

     0   :  { %s147_s0 = inlined_call_operand.vmem [shape: f32[8,256], index: 0, kind: input, shape index: {}]   ;;  %s148_s1 = inlined_call_operand.vmem [shape: f32[8,1], index: 1, kind: input, shape index: {}]   ;;  %s149_s2 = inlined_call_operand.vmem [shape: f32[8,1], index: 2, kind: input, shape index: {}]   ;;  %s150_s3 = inlined_call_operand.hbm [shape: f32[8,256], index: 3, kind: output, shape index: {}]  }
   0x1   :  { %v15_v0 = vld [vmem:[%s147_s0] sm:$0xff]  ;;  %v16_v1 = vld [vmem:[%s147_s0 + $0x8] sm:$0xff] }
   0x2   :  { %8 = vsyncpa [#allocation3], 0  ;;  %v17_v2 = vadd.f32 %v16_v1, %v15_v0  ;;  %v20_v3 = vmul.f32 %v15_v0, %v15_v0  ;;  %v21_v4 = vmul.f32 %v16_v1, %v16_v1  ;;  %v110_v6 = vmov 0   ;;  %v30_v20 = vld [vmem:[%s148_s1] sm:$0xff]  ;;  %s111_s19 = smov [#allocation2]   ;;  %s69_s22 = sshll.u32 %s150_s3, 4  ;;  %s70_s22 = int_to_ptr.hbm [resolvable:$true] %s69_s22 }
   0x3   :  { %80 = vset.pattern.permute.xlu1 %v110_v6  ;;  %81 = vset.pattern.permute.xlu0 %v110_v6  ;;  %v31_v24 = vld [vmem:[%s149_s2] sm:$0xff]  ;;  %s67_s20 = sshll.u32 %s111_s19, 4  ;;  %s68_s20 = int_to_ptr.vmem [resolvable:$true] %s67_s20 }
   0x4   :  { %18 = vadd.xlane.f32.xlu0 %v17_v2  ;;  %v22_v5 = vadd.f32 %v21_v4, %v20_v3 }
   0xc   :  { %23 = vadd.xlane.f32.xlu0 %v22_v5 }
  0x77   :  { %v19_v7 = vpop.xlane.xlu0 %18 }
  0x78   :  { %v25_v8 = vmul.f32 0.00390625, %v19_v7 }
  0x7a   :  { %v26_v9 = vmul.f32 %v25_v8, %v19_v7  ;;  %v44_v26 = vsub.f32 %v15_v0, %v25_v8  ;;  %v45_v27 = vsub.f32 %v16_v1, %v25_v8 }
  0x7f   :  { %v24_v10 = vpop.xlane.xlu0 %23 }
  0x80   :  { %v27_v11 = vsub.f32 %v24_v10, %v26_v9 }
  0x82   :  { %v28_v12 = vmul.f32 0.003921569, %v27_v11 }
  0x84   :  { %v29_v13 = vmax.f32 %v28_v12, 0.0 }
  0x86   :  { %v32_v14 = vadd.f32 1e-05, %v29_v13 }
  0x88   :  { %82 = vrsqrt.f32 %v32_v14  ;;  %vm39_vm1 = vweird.f32 %v32_v14 }
  0x8e   :  { %v83_v15 = vpop.eup %82 }
  0x8f   :  { %v34_v16 = vmul.f32 %v83_v15, %v32_v14  ;;  %vm40_vm0 = vweird.f32 %v83_v15 }
  0x90   :  { %vm41_vm2 = vmor %vm39_vm1, %vm40_vm0 }
  0x91   :  { %v35_v17 = vmul.f32 %v83_v15, %v34_v16 }
  0x93   :  { %v36_v18 = vmul.f32 0.5, %v35_v17 }
  0x95   :  { %v37_v19 = vsub.f32 1.5, %v36_v18 }
  0x97   :  { %v38_v21 = vmul.f32 %v83_v15, %v37_v19 }
  0x99   :  { %v42_v22 = vsel %vm41_vm2, %v83_v15, %v38_v21 }
  0x9a   :  { %v43_v23 = vmul.f32 %v42_v22, %v30_v20 }
  0x9c   :  { %48 = vperm.xlu1 %80, %v43_v23  }
  0xa4   :  { %55 = vperm.xlu1 %80, %v31_v24  }
 0x10e   :  { %v49_v25 = vpop.permute.xlu1 %48 }
 0x10f   :  { %v51_v28 = vmul.f32 %v49_v25, %v44_v26  ;;  %v52_v29 = vmul.f32 %v49_v25, %v45_v27 }
 0x116   :  { %v56_v30 = vpop.permute.xlu1 %55 }
 0x117   :  { %v58_v31 = vadd.f32 %v56_v30, %v51_v28  ;;  %v59_v32 = vadd.f32 %v56_v30, %v52_v29 }
 0x119   :  { %60 = vst [vmem:[#allocation2] sm:$0xff] %v58_v31 }
 0x11a   :  { %61 = vst [vmem:[#allocation2 + $0x8] sm:$0xff] %v59_v32 }
 0x11b   :  { %72 = dma.vmem_to_hbm [thread:$0]  %s68_s20, 256, %s70_s22, [#allocation3]  }
 0x11c   :  { %108 = dma.done.wait [#allocation3], 256  }
 0x11d   :  { %109 = vsyncadd [#allocation3], 4294967040 }
 0x11e   :  { %77 = vsyncpa [#allocation3], 1 }

</bundles_post_ra>
